<compile_context>
chip_gen: v7x
topology: tpu7x:2x2x1
jax: 0.10.0
libtpu: 0.0.40
codegen_flags: <defaults>
</compile_context>

<pallas_src>
import functools

import numpy as np

import jax
import jax.numpy as jnp
from jax.experimental import pallas as pl
from jax.experimental.pallas import tpu as pltpu


# VMEM budgeting: 48 MiB is safe on every generation (v7x physical VMEM is
# 64 MiB) and is an explicit raise over v5e's 16 MiB scoped default.
_VMEM_LIMIT = 48 * 1024 * 1024
_VMEM_TILE_BUDGET = 40 * 1024 * 1024   # headroom for weights / biases / semaphores


def _cdiv(a, b):
    return -(-a // b)


def _choose_tile(hw, tile_hw, bytes_per_lane, budget=_VMEM_TILE_BUDGET):
    """128-aligned spatial (lane) tile that fits the VMEM budget and divides HW
    near-evenly; when multi-tile, prefer an even tile count (v7x megacore)."""
    t_cap = max(128, ((budget // max(bytes_per_lane, 1)) // 128) * 128)
    t = max(128, (min(tile_hw, t_cap) // 128) * 128)
    if hw <= t:
        return hw                       # full-extent block (allowed even if hw % 128 != 0)
    num_tiles = _cdiv(hw, t)
    if num_tiles % 2 == 1:
        num_tiles += 1                  # even split across v7x's 2 TensorCores
    return min(hw, max(128, _cdiv(_cdiv(hw, num_tiles), 128) * 128))


# ---------------------------------------------------------------------------
# Kernel 1: gated 1x1 conv (full-resolution output)
# ---------------------------------------------------------------------------
def _gated_conv_kernel(x_ref, w_ref, b_ref, o_ref, *, c_out, matmul_dtype):
    # x_ref: (NB, C_in, T)  w_ref: (2*C_out, C_in)  b_ref: (2*C_out, 1)  o_ref: (NB, C_out, T)
    w = w_ref[...]
    b = b_ref[...]
    for bidx in range(x_ref.shape[0]):                   # static, small batch -> unrolled
        x_b = x_ref[bidx].astype(matmul_dtype)           # (C_in, T)
        r = jnp.dot(w, x_b, preferred_element_type=jnp.float32) + b   # (2*C_out, T) f32
        # NOTE: c_out should be a multiple of 8 (f32 sublane tile) for a free slice.
        conv = r[:c_out, :]
        gate = r[c_out:, :]
        o_ref[bidx] = (conv * jax.nn.sigmoid(gate)).astype(o_ref.dtype)


@functools.partial(jax.jit, static_argnames=("tile_hw", "matmul_dtype", "out_dtype"))
def frequency_aware_gated_conv2d(x, w_conv, b_conv, w_gate, b_gate, *,
                                 tile_hw=8192, matmul_dtype=jnp.bfloat16,
                                 out_dtype=None):
    """x: (N, C_in, H, W) NCHW.  w_*: (C_out, C_in, 1, 1).  b_*: (C_out,)."""
    n, c_in, h, w = x.shape
    c_out = w_conv.shape[0]
    hw = h * w
    out_dtype = x.dtype if out_dtype is None else jnp.dtype(out_dtype)
    out_itemsize = jnp.dtype(out_dtype).itemsize

    # Flattening the two trailing contiguous dims is a copy-free reshape.
    x3 = x.reshape(n, c_in, hw)

    # One fused weight operand: rows [0, C_out) = conv, rows [C_out, 2*C_out) = gate.
    w_cat = jnp.concatenate(
        [w_conv.reshape(c_out, c_in), w_gate.reshape(c_out, c_in)], axis=0
    ).astype(matmul_dtype)                                           # (2*C_out, C_in)
    b_cat = jnp.concatenate([b_conv, b_gate], axis=0).reshape(2 * c_out, 1).astype(jnp.float32)

    # Per-lane VMEM bytes (double-buffered x/out + f32 intermediates).
    def lane_bytes(nb):
        return (2 * nb * c_in * x.dtype.itemsize
                + 2 * nb * c_out * out_itemsize
                + 2 * c_out * 4 + c_out * 4
                + c_in * jnp.dtype(matmul_dtype).itemsize)

    # Fold the whole batch into each step when it fits (N x fewer grid steps).
    n_block = n
    if n > 1 and lane_bytes(n) * 128 > _VMEM_TILE_BUDGET:
        n_block = 1
    t_hw = _choose_tile(hw, tile_hw, lane_bytes(n_block))
    num_tiles = _cdiv(hw, t_hw)

    kernel = functools.partial(_gated_conv_kernel, c_out=c_out, matmul_dtype=matmul_dtype)

    # Advisory cost estimate for the XLA scheduler around the custom call.
    cost = pl.CostEstimate(
        flops=4 * n * hw * c_in * c_out,
        transcendentals=n * hw * c_out,
        bytes_accessed=(n * c_in * hw * x.dtype.itemsize
                        + n * c_out * hw * out_itemsize
                        + w_cat.size * w_cat.dtype.itemsize + b_cat.size * 4))

    if n_block == n:
        grid = (num_tiles,)
        x_map = lambda j: (0, 0, j)
        o_map = lambda j: (0, 0, j)
        w_map = lambda j: (0, 0)            # constant index_map -> weights stay resident
        dims = ("parallel",)
    else:
        grid = (n, num_tiles)
        x_map = lambda b, j: (b, 0, j)
        o_map = lambda b, j: (b, 0, j)
        w_map = lambda b, j: (0, 0)
        dims = ("parallel", "parallel")

    out3 = pl.pallas_call(
        kernel,
        out_shape=jax.ShapeDtypeStruct((n, c_out, hw), out_dtype),
        grid_spec=pltpu.PrefetchScalarGridSpec(
            num_scalar_prefetch=0,
            grid=grid,
            in_specs=[
                pl.BlockSpec((n_block, c_in, t_hw), x_map),
                pl.BlockSpec((2 * c_out, c_in), w_map),
                pl.BlockSpec((2 * c_out, 1), w_map),
            ],
            out_specs=pl.BlockSpec((n_block, c_out, t_hw), o_map),
        ),
        compiler_params=pltpu.CompilerParams(
            dimension_semantics=dims,
            vmem_limit_bytes=_VMEM_LIMIT,
        ),
        cost_estimate=cost,
    )(x3, w_cat, b_cat)

    return out3.reshape(n, c_out, h, w)


# ---------------------------------------------------------------------------
# Kernel 2: gated 1x1 conv fused with AdaptiveAvgPool2d (cross=True path)
# ---------------------------------------------------------------------------
def _gated_conv_pool_kernel(x_ref, w_ref, b_ref, p_ref, o_ref, acc_ref, *,
                            c_out, hw, t_hw, matmul_dtype):
    # x_ref: (1, C_in, T)  p_ref: (T, n_bins)  o_ref: (1, C_out, n_bins)
    # acc_ref: (C_out, n_bins) f32 scratch, accumulated across the spatial-tile axis.
    j = pl.program_id(1)

    @pl.when(j == 0)
    def _():
        acc_ref[...] = jnp.zeros_like(acc_ref)

    # Ragged-tail masking: zero both the gated columns and the pooling-matrix
    # rows that fall beyond HW (OOB block reads are unspecified).
    lane_row = j * t_hw + jax.lax.broadcasted_iota(jnp.int32, (1, t_hw), 1)
    lane_col = j * t_hw + jax.lax.broadcasted_iota(jnp.int32, (t_hw, 1), 0)

    x_b = x_ref[0].astype(matmul_dtype)                               # (C_in, T)
    r = jnp.dot(w_ref[...], x_b, preferred_element_type=jnp.float32) + b_ref[...]
    gated = r[:c_out, :] * jax.nn.sigmoid(r[c_out:, :])               # (C_out, T) f32
    gated = jnp.where(lane_row < hw, gated, 0.0)
    p = jnp.where(lane_col < hw, p_ref[...], 0.0)                     # (T, n_bins) f32

    acc_ref[...] += jnp.dot(gated, p, preferred_element_type=jnp.float32)

    @pl.when(j == pl.num_programs(1) - 1)
    def _():
        o_ref[0] = acc_ref[...].astype(o_ref.dtype)


def _pool_matrix(in_size, out_size):
    """(in_size, out_size) adaptive-average-pool matrix (PyTorch binning)."""
    m = np.zeros((in_size, out_size), np.float32)
    for i in range(out_size):
        s = (i * in_size) // out_size
        e = -((-(i + 1) * in_size) // out_size)
        m[s:e, i] = 1.0 / (e - s)
    return m


@functools.partial(jax.jit,
                   static_argnames=("out_hw", "tile_hw", "matmul_dtype", "out_dtype"))
def frequency_aware_gated_conv2d_pooled(x, w_conv, b_conv, w_gate, b_gate, *,
                                        out_hw=(10, 50), tile_hw=8192,
                                        matmul_dtype=jnp.bfloat16, out_dtype=None):
    """Fused gating + AdaptiveAvgPool2d(out_hw): only the pooled tensor hits HBM."""
    n, c_in, h, w = x.shape
    c_out = w_conv.shape[0]
    hw = h * w
    oh, ow = out_hw
    n_bins = oh * ow
    out_dtype = x.dtype if out_dtype is None else jnp.dtype(out_dtype)

    x3 = x.reshape(n, c_in, hw)
    w_cat = jnp.concatenate(
        [w_conv.reshape(c_out, c_in), w_gate.reshape(c_out, c_in)], axis=0
    ).astype(matmul_dtype)
    b_cat = jnp.concatenate([b_conv, b_gate], axis=0).reshape(2 * c_out, 1).astype(jnp.float32)

    # pooled[n,c,:] = gated3[n,c,:] @ P  with  P = kron(P_h, P_w)  of shape (HW, n_bins).
    pool_mat = jnp.asarray(np.kron(_pool_matrix(h, oh), _pool_matrix(w, ow)), jnp.float32)

    bytes_per_lane = (2 * c_in * x.dtype.itemsize      # x tile, double-buffered
                      + 2 * n_bins * 4                 # P tile, double-buffered
                      + 2 * c_out * 4 + c_out * 4      # f32 intermediates
                      + c_in * jnp.dtype(matmul_dtype).itemsize)
    t_hw = _choose_tile(hw, tile_hw, bytes_per_lane)
    num_tiles = _cdiv(hw, t_hw)

    kernel = functools.partial(_gated_conv_pool_kernel, c_out=c_out, hw=hw,
                               t_hw=t_hw, matmul_dtype=matmul_dtype)

    out3 = pl.pallas_call(
        kernel,
        out_shape=jax.ShapeDtypeStruct((n, c_out, n_bins), out_dtype),
        grid_spec=pltpu.PrefetchScalarGridSpec(
            num_scalar_prefetch=0,
            grid=(n, num_tiles),
            in_specs=[
                pl.BlockSpec((1, c_in, t_hw), lambda b, j: (b, 0, j)),
                pl.BlockSpec((2 * c_out, c_in), lambda b, j: (0, 0)),
                pl.BlockSpec((2 * c_out, 1), lambda b, j: (0, 0)),
                pl.BlockSpec((t_hw, n_bins), lambda b, j: (j, 0)),
            ],
            out_specs=pl.BlockSpec((1, c_out, n_bins), lambda b, j: (b, 0, 0)),
            scratch_shapes=[pltpu.VMEM((c_out, n_bins), jnp.float32)],
        ),
        compiler_params=pltpu.CompilerParams(
            dimension_semantics=("parallel", "arbitrary"),
            vmem_limit_bytes=_VMEM_LIMIT,
        ),
    )(x3, w_cat, b_cat, pool_mat)

    return out3.reshape(n, c_out, oh, ow)


# ---------------------------------------------------------------------------
# Plain-JAX adaptive pooling (reference only) and module-level forward
# ---------------------------------------------------------------------------
def adaptive_avg_pool2d(x, out_hw):
    """Plain-JAX nn.AdaptiveAvgPool2d replica (used as a reference check)."""
    _, _, hh, ww = x.shape
    oh, ow = out_hw

    def pool_axis(arr, size, out_size, axis):
        slabs = []
        for i in range(out_size):
            s = (i * size) // out_size
            e = -((-(i + 1) * size) // out_size)
            slabs.append(jnp.mean(jax.lax.slice_in_dim(arr, s, e, axis=axis),
                                  axis=axis, keepdims=True))
        return jnp.concatenate(slabs, axis=axis)

    x = pool_axis(x, hh, oh, 2)
    x = pool_axis(x, ww, ow, 3)
    return x


def forward(x, params, cross=False, matmul_dtype=jnp.bfloat16, out_dtype=None):
    args = (x, params["w_conv"], params["b_conv"], params["w_gate"], params["b_gate"])
    if cross:
        return frequency_aware_gated_conv2d_pooled(
            *args, matmul_dtype=matmul_dtype, out_dtype=out_dtype)
    return frequency_aware_gated_conv2d(
        *args, matmul_dtype=matmul_dtype, out_dtype=out_dtype)


if __name__ == "__main__":
    key = jax.random.PRNGKey(0)
    # Small, module-consistent shapes (Freq_branch uses FrequencyAwareGatedConv2d(C, 2C)).
    n, c_in, c_out, h, w = 2, 32, 64, 16, 16

    k_x, k_wc, k_bc, k_wg, k_bg, k_x2 = jax.random.split(key, 6)
    x = jax.random.normal(k_x, (n, c_in, h, w), dtype=jnp.float32)

    bound = 1.0 / (c_in ** 0.5)
    params = {
        "w_conv": jax.random.uniform(k_wc, (c_out, c_in, 1, 1), jnp.float32, -bound, bound),
        "b_conv": jax.random.uniform(k_bc, (c_out,), jnp.float32, -bound, bound),
        "w_gate": jax.random.uniform(k_wg, (c_out, c_in, 1, 1), jnp.float32, -bound, bound),
        "b_gate": jax.random.uniform(k_bg, (c_out,), jnp.float32, -bound, bound),
    }

    # Pure-JAX reference (1x1 conv == channel matmul), f32.
    def reference(xr):
        xc = jnp.einsum("nchw,oc->nohw", xr, params["w_conv"].reshape(c_out, c_in)) \
            + params["b_conv"][None, :, None, None]
        xg = jnp.einsum("nchw,oc->nohw", xr, params["w_gate"].reshape(c_out, c_in)) \
            + params["b_gate"][None, :, None, None]
        return xc * jax.nn.sigmoid(xg)

    ref = reference(x)

    # Exact-math path (f32 matmul inputs) -> tight tolerance.
    out_f32 = forward(x, params, cross=False, matmul_dtype=jnp.float32)
    jax.block_until_ready(out_f32)
    assert out_f32.shape == (n, c_out, h, w)
    assert jnp.allclose(out_f32, ref, atol=1e-4, rtol=1e-4)

    # Default fast path (bf16 matmul inputs, f32 accumulate/epilogue).
    out = forward(x, params, cross=False)
    jax.block_until_ready(out)
    assert out.shape == (n, c_out, h, w)
    assert jnp.allclose(out, ref, atol=2e-2, rtol=2e-2)

    # bf16 output path (halves the dominant HBM write; loose tolerance).
    out_bf16 = forward(x, params, cross=False, out_dtype=jnp.bfloat16)
    jax.block_until_ready(out_bf16)
    assert out_bf16.dtype == jnp.bfloat16
    assert jnp.allclose(out_bf16.astype(jnp.float32), ref, atol=5e-2, rtol=5e-2)

    # Multi-tile, batch-folded grid (HW=256 with tile=128 -> grid (2,)).
    out_tiled = frequency_aware_gated_conv2d(
        x, params["w_conv"], params["b_conv"], params["w_gate"], params["b_gate"],
        tile_hw=128, matmul_dtype=jnp.float32)
    jax.block_until_ready(out_tiled)
    assert jnp.allclose(out_tiled, ref, atol=1e-4, rtol=1e-4)

    # cross=True branch: gating fused with AdaptiveAvgPool2d((10, 50)) in-kernel.
    out_cross = forward(x, params, cross=True, matmul_dtype=jnp.float32)
    jax.block_until_ready(out_cross)
    ref_cross = adaptive_avg_pool2d(ref, (10, 50))
    assert out_cross.shape == (n, c_out, 10, 50)
    assert jnp.allclose(out_cross, ref_cross, atol=1e-4, rtol=1e-4)

    # cross=True with a ragged multi-tile reduction (HW=320, tile=128 -> masked tail).
    x2 = jax.random.normal(k_x2, (n, c_in, 16, 20), dtype=jnp.float32)
    out_cross2 = frequency_aware_gated_conv2d_pooled(
        x2, params["w_conv"], params["b_conv"], params["w_gate"], params["b_gate"],
        tile_hw=128, matmul_dtype=jnp.float32)
    jax.block_until_ready(out_cross2)
    ref_cross2 = adaptive_avg_pool2d(reference(x2), (10, 50))
    assert out_cross2.shape == (n, c_out, 10, 50)
    assert jnp.allclose(out_cross2, ref_cross2, atol=1e-4, rtol=1e-4)

    print("KERNEL_OK")
</pallas_src>

<mosaic_0001>
module attributes {stable_mosaic.version = 11 : i64} {
  func.func @_gated_conv_kernel(%arg0: i32, %arg1: memref<2x32x256xf32, #tpu.memory_space<vmem>>, %arg2: memref<128x32xf32, #tpu.memory_space<vmem>>, %arg3: memref<128x1xf32, #tpu.memory_space<vmem>>, %arg4: memref<2x64x256xf32, #tpu.memory_space<vmem>>) attributes {dimension_semantics = [#tpu.dimension_semantics<parallel>], iteration_bounds = array<i64: 1>, scalar_prefetch = 0 : i64, scratch_operands = 0 : i64, tpu.core_type = #tpu.core_type<tc>, window_params = [{transform_indices = @transform_0, window_bounds = array<i64: 2, 32, 256>}, {pipeline_mode = #tpu.pipeline_mode<synchronous>, transform_indices = @transform_1, window_bounds = array<i64: 128, 32>}, {pipeline_mode = #tpu.pipeline_mode<synchronous>, transform_indices = @transform_2, window_bounds = array<i64: 128, 1>}, {transform_indices = @transform_3, window_bounds = array<i64: 2, 64, 256>}]} {
    %c0 = arith.constant 0 : index
    %c0_0 = arith.constant 0 : index
    %0 = vector.load %arg2[%c0, %c0_0] : memref<128x32xf32, #tpu.memory_space<vmem>>, vector<128x32xf32>
    %c0_1 = arith.constant 0 : index
    %c0_2 = arith.constant 0 : index
    %1 = vector.load %arg3[%c0_1, %c0_2] : memref<128x1xf32, #tpu.memory_space<vmem>>, vector<128x1xf32>
    %c0_3 = arith.constant 0 : index
    %c0_4 = arith.constant 0 : index
    %c0_5 = arith.constant 0 : index
    %2 = vector.load %arg1[%c0_3, %c0_4, %c0_5] : memref<2x32x256xf32, #tpu.memory_space<vmem>>, vector<1x32x256xf32>
    %3 = vector.shape_cast %2 : vector<1x32x256xf32> to vector<32x256xf32>
    %cst = arith.constant dense<0.000000e+00> : vector<128x256xf32>
    %4 = tpu.matmul %0, %3, %cst {dimension_numbers = #tpu.dot_dimension_numbers<[1], [0], [0], [1], [0, 0, 1, 1], [], []>} : vector<128x32xf32>, vector<32x256xf32>, vector<128x256xf32> -> vector<128x256xf32>
    %5 = vector.broadcast %1 : vector<128x1xf32> to vector<128x256xf32>
    %6 = arith.addf %4, %5 : vector<128x256xf32>
    %7 = vector.extract_strided_slice %6 {offsets = [0, 0], sizes = [64, 256], strides = [1, 1]} : vector<128x256xf32> to vector<64x256xf32>
    %8 = vector.extract_strided_slice %6 {offsets = [64, 0], sizes = [64, 256], strides = [1, 1]} : vector<128x256xf32> to vector<64x256xf32>
    %9 = arith.negf %8 : vector<64x256xf32>
    %10 = math.exp %9 : vector<64x256xf32>
    %cst_6 = arith.constant 1.000000e+00 : f32
    %11 = vector.broadcast %cst_6 : f32 to vector<64x256xf32>
    %12 = arith.addf %11, %10 : vector<64x256xf32>
    %13 = arith.divf %11, %12 : vector<64x256xf32>
    %14 = arith.mulf %7, %13 : vector<64x256xf32>
    %c0_7 = arith.constant 0 : index
    %c0_8 = arith.constant 0 : index
    %c0_9 = arith.constant 0 : index
    %15 = vector.load %arg4[%c0_7, %c0_8, %c0_9] : memref<2x64x256xf32, #tpu.memory_space<vmem>>, vector<1x64x256xf32>
    %16 = vector.shape_cast %15 : vector<1x64x256xf32> to vector<64x256xf32>
    %17 = vector.shape_cast %14 : vector<64x256xf32> to vector<1x64x256xf32>
    tpu.vector_store %arg4[%c0_7, %c0_8, %c0_9], %17 {strides = array<i32>} : memref<2x64x256xf32, #tpu.memory_space<vmem>>, vector<1x64x256xf32>,
    %c1 = arith.constant 1 : index
    %c0_10 = arith.constant 0 : index
    %c0_11 = arith.constant 0 : index
    %18 = vector.load %arg1[%c1, %c0_10, %c0_11] : memref<2x32x256xf32, #tpu.memory_space<vmem>>, vector<1x32x256xf32>
    %19 = vector.shape_cast %18 : vector<1x32x256xf32> to vector<32x256xf32>
    %cst_12 = arith.constant dense<0.000000e+00> : vector<128x256xf32>
    %20 = tpu.matmul %0, %19, %cst_12 {dimension_numbers = #tpu.dot_dimension_numbers<[1], [0], [0], [1], [0, 0, 1, 1], [], []>} : vector<128x32xf32>, vector<32x256xf32>, vector<128x256xf32> -> vector<128x256xf32>
    %21 = vector.broadcast %1 : vector<128x1xf32> to vector<128x256xf32>
    %22 = arith.addf %20, %21 : vector<128x256xf32>
    %23 = vector.extract_strided_slice %22 {offsets = [0, 0], sizes = [64, 256], strides = [1, 1]} : vector<128x256xf32> to vector<64x256xf32>
    %24 = vector.extract_strided_slice %22 {offsets = [64, 0], sizes = [64, 256], strides = [1, 1]} : vector<128x256xf32> to vector<64x256xf32>
    %25 = arith.negf %24 : vector<64x256xf32>
    %26 = math.exp %25 : vector<64x256xf32>
    %cst_13 = arith.constant 1.000000e+00 : f32
    %27 = vector.broadcast %cst_13 : f32 to vector<64x256xf32>
    %28 = arith.addf %27, %26 : vector<64x256xf32>
    %29 = arith.divf %27, %28 : vector<64x256xf32>
    %30 = arith.mulf %23, %29 : vector<64x256xf32>
    %c1_14 = arith.constant 1 : index
    %c0_15 = arith.constant 0 : index
    %c0_16 = arith.constant 0 : index
    %31 = vector.load %arg4[%c1_14, %c0_15, %c0_16] : memref<2x64x256xf32, #tpu.memory_space<vmem>>, vector<1x64x256xf32>
    %32 = vector.shape_cast %31 : vector<1x64x256xf32> to vector<64x256xf32>
    %33 = vector.shape_cast %30 : vector<64x256xf32> to vector<1x64x256xf32>
    tpu.vector_store %arg4[%c1_14, %c0_15, %c0_16], %33 {strides = array<i32>} : memref<2x64x256xf32, #tpu.memory_space<vmem>>, vector<1x64x256xf32>,
    return
  }
  func.func @transform_0(%arg0: i32) -> (i32, i32, i32) {
    %c0_i32 = arith.constant 0 : i32
    %c0_i32_0 = arith.constant 0 : i32
    %c0_i32_1 = arith.constant 0 : i32
    return %c0_i32, %c0_i32_0, %arg0 : i32, i32, i32
  }
  func.func @transform_1(%arg0: i32) -> (i32, i32) {
    %c0_i32 = arith.constant 0 : i32
    %c0_i32_0 = arith.constant 0 : i32
    %c0_i32_1 = arith.constant 0 : i32
    return %c0_i32, %c0_i32_0 : i32, i32
  }
  func.func @transform_2(%arg0: i32) -> (i32, i32) {
    %c0_i32 = arith.constant 0 : i32
    %c0_i32_0 = arith.constant 0 : i32
    %c0_i32_1 = arith.constant 0 : i32
    return %c0_i32, %c0_i32_0 : i32, i32
  }
  func.func @transform_3(%arg0: i32) -> (i32, i32, i32) {
    %c0_i32 = arith.constant 0 : i32
    %c0_i32_0 = arith.constant 0 : i32
    %c0_i32_1 = arith.constant 0 : i32
    return %c0_i32, %c0_i32_0, %arg0 : i32, i32, i32
  }
}

</mosaic_0001>

<bundles_post_ra>
// kernel: frequency_aware_gated_conv2d.1
= control target key start
LH: loop header
LB: loop body
LE: loop exit
PB: predicated region body
PF: predicated region fallthrough
CT: control target
= control target key end

     0   :  { %v1011_v3 = vmov 0.0   ;;  %v1012_v8 = vmov 0   ;;  %vm134_vm0 = vcmask 261120   ;;  %s1526_s0 = inlined_call_operand.vmem [shape: f32[2,32,256], index: 0, kind: input, shape index: {}]   ;;  %s1527_s1 = inlined_call_operand.vmem [shape: f32[128,32], index: 1, kind: input, shape index: {}]   ;;  %s1528_s2 = inlined_call_operand.vmem [shape: f32[128,1], index: 2, kind: input, shape index: {}]   ;;  %s1529_s3 = inlined_call_operand.vmem [shape: f32[2,64,256], index: 3, kind: output, shape index: {}]  }
   0x1   :  { %v47_v0 = vld [vmem:[%s1526_s0 + $0x8] sm:$0xff]  ;;  %v49_v1 = vld [vmem:[%s1526_s0 + $0x18] sm:$0xff]  ;;  %247 = vmatprep.mubr.f32.mxu0 %v1011_v3  ;;  %545 = vmatprep.mubr.f32.mxu1 %v1011_v3  ;;  %v46_v6 = vld [vmem:[%s1526_s0] sm:$0xff] }
   0x2   :  { %v808_v2 = vld [vmem:[%s1526_s0 + $0x48] sm:$0xff]  ;;  %v863_v4 = vpack.c.bf16 %v49_v1, %v47_v0  ;;  %v810_v5 = vld [vmem:[%s1526_s0 + $0x58] sm:$0xff]  ;;  %v48_v7 = vld [vmem:[%s1526_s0 + $0x10] sm:$0xff]  ;;  %881 = vset.pattern.permute.xlu0 %v1012_v8  ;;  %882 = vset.pattern.permute.xlu1 %v1012_v8 }
   0x3   :  { %v871_v9 = vpack.c.bf16 %v810_v5, %v808_v2  ;;  %v865_v10 = vpack.c.bf16 %v48_v7, %v46_v6  ;;  %v807_v11 = vld [vmem:[%s1526_s0 + $0x40] sm:$0xff]  ;;  %v809_v12 = vld [vmem:[%s1526_s0 + $0x50] sm:$0xff]  ;;  %v51_v13 = vld [vmem:[%s1526_s0 + $0x28] sm:$0xff] }
   0x4   :  { %864 = vmatprep.subr.bf16.mxu0 %v863_v4  ;;  %v873_v14 = vpack.c.bf16 %v809_v12, %v807_v11  ;;  %v53_v15 = vld [vmem:[%s1526_s0 + $0x38] sm:$0xff]  ;;  %v812_v16 = vld [vmem:[%s1526_s0 + $0x68] sm:$0xff]  ;;  %v50_v20 = vld [vmem:[%s1526_s0 + $0x20] sm:$0xff] }
   0x5   :  { %v814_v17 = vld [vmem:[%s1526_s0 + $0x78] sm:$0xff]  ;;  %872 = vmatprep.subr.bf16.mxu1 %v871_v9  ;;  %866 = vmatpush1.bf16.msra.mxu0 %v865_v10  ;;  %v867_v18 = vpack.c.bf16 %v53_v15, %v51_v13  ;;  %v52_v21 = vld [vmem:[%s1526_s0 + $0x30] sm:$0xff]  ;;  %v811_v22 = vld [vmem:[%s1526_s0 + $0x60] sm:$0xff] }
   0x6   :  { %v875_v19 = vpack.c.bf16 %v814_v17, %v812_v16  ;;  %874 = vmatpush1.bf16.msra.mxu1 %v873_v14  ;;  %v869_v23 = vpack.c.bf16 %v52_v21, %v50_v20  ;;  %v813_v24 = vld [vmem:[%s1526_s0 + $0x70] sm:$0xff]  ;;  %v14_v26 = vld [vmem:[%s1527_s1] sm:$0xff]  ;;  %v15_v29 = vld [vmem:[%s1527_s1 + $0x8] sm:$0xff] }
   0x7   :  { %868 = vmatprep.subr.bf16.mxu0 %v867_v18  ;;  %v877_v25 = vpack.c.bf16 %v813_v24, %v811_v22  ;;  %v38_v27 = vld [vmem:[%s1528_s2 + $0x40] sm:$0xff]  ;;  %v40_v28 = vld [vmem:[%s1528_s2 + $0x50] sm:$0xff]  ;;  %v39_v30 = vld [vmem:[%s1528_s2 + $0x48] sm:$0xff] }
   0x8   :  { %876 = vmatprep.subr.bf16.mxu1 %v875_v19  ;;  %96 = vperm.xlu0 %881, %v38_v27   ;;  %v41_v31 = vld [vmem:[%s1528_s2 + $0x58] sm:$0xff]  ;;  %v16_v32 = vld [vmem:[%s1527_s1 + $0x10] sm:$0xff]  ;;  %v42_v33 = vld [vmem:[%s1528_s2 + $0x60] sm:$0xff] }
   0x9   :  { %870 = vmatpush1.bf16.msra.mxu0 %v869_v23  ;;  %106 = vperm.xlu1 %882, %v40_v28   ;;  %v43_v34 = vld [vmem:[%s1528_s2 + $0x68] sm:$0xff]  ;;  %v17_v35 = vld [vmem:[%s1527_s1 + $0x18] sm:$0xff]  ;;  %v44_v36 = vld [vmem:[%s1528_s2 + $0x70] sm:$0xff] }
   0xa   :  { %878 = vmatpush1.bf16.msra.mxu1 %v877_v25  ;;  %v45_v37 = vld [vmem:[%s1528_s2 + $0x78] sm:$0xff]  ;;  %v18_v38 = vld [vmem:[%s1527_s1 + $0x20] sm:$0xff]  ;;  %v31_v40 = vld [vmem:[%s1528_s2 + $0x8] sm:$0xff] }
   0xb   :  { %v30_v39 = vld [vmem:[%s1528_s2] sm:$0xff]  ;;  %v19_v41 = vld [vmem:[%s1527_s1 + $0x28] sm:$0xff]  ;;  %v32_v42 = vld [vmem:[%s1528_s2 + $0x10] sm:$0xff] }
   0xc   :  { %775 = vmatmul.mubr.msk.f32.vlgmr.msra.gmra.mrb[0].mxu0 %vm134_vm0, %v14_v26  ;;  %101 = vperm.xlu0 %881, %v39_v30   ;;  %v33_v43 = vld [vmem:[%s1528_s2 + $0x18] sm:$0xff]  ;;  %v20_v44 = vld [vmem:[%s1527_s1 + $0x30] sm:$0xff]  ;;  %v34_v45 = vld [vmem:[%s1528_s2 + $0x20] sm:$0xff] }
   0xd   :  { %815 = vmatmul.mubr.msk.f32.vlgmr.msra.gmra.mrb[0].mxu1 %vm134_vm0, %v14_v26  ;;  %253 = vmatprep.mubr.f32.mxu0 %v1011_v3  ;;  %v35_v46 = vld [vmem:[%s1528_s2 + $0x28] sm:$0xff]  ;;  %v21_v47 = vld [vmem:[%s1527_s1 + $0x38] sm:$0xff]  ;;  %v36_v48 = vld [vmem:[%s1528_s2 + $0x30] sm:$0xff] }
   0xe   :  { %551 = vmatprep.mubr.f32.mxu1 %v1011_v3  ;;  %111 = vperm.xlu1 %882, %v41_v31   ;;  %v37_v49 = vld [vmem:[%s1528_s2 + $0x38] sm:$0xff]  ;;  %v22_v50 = vld [vmem:[%s1527_s1 + $0x40] sm:$0xff]  ;;  %v23_v51 = vld [vmem:[%s1527_s1 + $0x48] sm:$0xff] }
   0xf   :  { %v24_v52 = vld [vmem:[%s1527_s1 + $0x50] sm:$0xff]  ;;  %v25_v53 = vld [vmem:[%s1527_s1 + $0x58] sm:$0xff]  ;;  %v26_v54 = vld [vmem:[%s1527_s1 + $0x60] sm:$0xff] }
  0x10   :  { %776 = vmatmul.mubr.msk.f32.gmra.mrb[2].mxu0 %vm134_vm0, %v15_v29  ;;  %116 = vperm.xlu0 %881, %v42_v33   ;;  %v27_v55 = vld [vmem:[%s1527_s1 + $0x68] sm:$0xff]  ;;  %v28_v56 = vld [vmem:[%s1527_s1 + $0x70] sm:$0xff]  ;;  %v29_v57 = vld [vmem:[%s1527_s1 + $0x78] sm:$0xff] }
  0x11   :  { %816 = vmatmul.mubr.msk.f32.gmra.mrb[2].mxu1 %vm134_vm0, %v15_v29  ;;  %259 = vmatprep.mubr.f32.mxu0 %v1011_v3 }
  0x12   :  { %557 = vmatprep.mubr.f32.mxu1 %v1011_v3  ;;  %121 = vperm.xlu1 %882, %v43_v34  }
  0x14   :  { %777 = vmatmul.mubr.msk.f32.gmra.mrb[4].mxu0 %vm134_vm0, %v16_v32  ;;  %126 = vperm.xlu0 %881, %v44_v36  }
  0x15   :  { %817 = vmatmul.mubr.msk.f32.gmra.mrb[4].mxu1 %vm134_vm0, %v16_v32  ;;  %265 = vmatprep.mubr.f32.mxu0 %v1011_v3 }
  0x16   :  { %563 = vmatprep.mubr.f32.mxu1 %v1011_v3  ;;  %131 = vperm.xlu1 %882, %v45_v37  }
  0x18   :  { %778 = vmatmul.mubr.msk.f32.gmra.mrb[6].mxu0 %vm134_vm0, %v17_v35  ;;  %56 = vperm.xlu0 %881, %v30_v39  }
  0x19   :  { %818 = vmatmul.mubr.msk.f32.gmra.mrb[6].mxu1 %vm134_vm0, %v17_v35  ;;  %271 = vmatprep.mubr.f32.mxu0 %v1011_v3 }
  0x1a   :  { %569 = vmatprep.mubr.f32.mxu1 %v1011_v3  ;;  %61 = vperm.xlu1 %882, %v31_v40  }
  0x1c   :  { %779 = vmatmul.mubr.msk.f32.gmra.mrb[8].mxu0 %vm134_vm0, %v18_v38  ;;  %66 = vperm.xlu0 %881, %v32_v42  }
  0x1d   :  { %819 = vmatmul.mubr.msk.f32.gmra.mrb[8].mxu1 %vm134_vm0, %v18_v38  ;;  %277 = vmatprep.mubr.f32.mxu0 %v1011_v3 }
  0x1e   :  { %575 = vmatprep.mubr.f32.mxu1 %v1011_v3  ;;  %71 = vperm.xlu1 %882, %v33_v43  }
  0x20   :  { %780 = vmatmul.mubr.msk.f32.gmra.mrb[10].mxu0 %vm134_vm0, %v19_v41  ;;  %76 = vperm.xlu0 %881, %v34_v45  }
  0x21   :  { %820 = vmatmul.mubr.msk.f32.gmra.mrb[10].mxu1 %vm134_vm0, %v19_v41  ;;  %283 = vmatprep.mubr.f32.mxu0 %v1011_v3 }
  0x22   :  { %581 = vmatprep.mubr.f32.mxu1 %v1011_v3  ;;  %81 = vperm.xlu1 %882, %v35_v46  }
  0x24   :  { %781 = vmatmul.mubr.msk.f32.gmra.mrb[12].mxu0 %vm134_vm0, %v20_v44  ;;  %86 = vperm.xlu0 %881, %v36_v48  }
  0x25   :  { %821 = vmatmul.mubr.msk.f32.gmra.mrb[12].mxu1 %vm134_vm0, %v20_v44  ;;  %289 = vmatprep.mubr.f32.mxu0 %v1011_v3 }
  0x26   :  { %587 = vmatprep.mubr.f32.mxu1 %v1011_v3  ;;  %91 = vperm.xlu1 %882, %v37_v49  }
  0x28   :  { %782 = vmatmul.mubr.msk.f32.gmra.mrb[14].mxu0 %vm134_vm0, %v21_v47 }
  0x29   :  { %822 = vmatmul.mubr.msk.f32.gmra.mrb[14].mxu1 %vm134_vm0, %v21_v47  ;;  %295 = vmatprep.mubr.f32.mxu0 %v1011_v3 }
  0x2a   :  { %593 = vmatprep.mubr.f32.mxu1 %v1011_v3 }
  0x2c   :  { %783 = vmatmul.mubr.msk.f32.gmra.mrb[16].mxu0 %vm134_vm0, %v22_v50 }
  0x2d   :  { %823 = vmatmul.mubr.msk.f32.gmra.mrb[16].mxu1 %vm134_vm0, %v22_v50  ;;  %301 = vmatprep.mubr.f32.mxu0 %v1011_v3 }
  0x2e   :  { %599 = vmatprep.mubr.f32.mxu1 %v1011_v3 }
  0x30   :  { %784 = vmatmul.mubr.msk.f32.gmra.mrb[18].mxu0 %vm134_vm0, %v23_v51 }
  0x31   :  { %824 = vmatmul.mubr.msk.f32.gmra.mrb[18].mxu1 %vm134_vm0, %v23_v51  ;;  %307 = vmatprep.mubr.f32.mxu0 %v1011_v3 }
  0x32   :  { %605 = vmatprep.mubr.f32.mxu1 %v1011_v3 }
  0x34   :  { %785 = vmatmul.mubr.msk.f32.gmra.mrb[20].mxu0 %vm134_vm0, %v24_v52 }
  0x35   :  { %825 = vmatmul.mubr.msk.f32.gmra.mrb[20].mxu1 %vm134_vm0, %v24_v52  ;;  %313 = vmatprep.mubr.f32.mxu0 %v1011_v3 }
  0x36   :  { %611 = vmatprep.mubr.f32.mxu1 %v1011_v3 }
  0x38   :  { %786 = vmatmul.mubr.msk.f32.gmra.mrb[22].mxu0 %vm134_vm0, %v25_v53 }
  0x39   :  { %826 = vmatmul.mubr.msk.f32.gmra.mrb[22].mxu1 %vm134_vm0, %v25_v53  ;;  %319 = vmatprep.mubr.f32.mxu0 %v1011_v3 }
  0x3a   :  { %617 = vmatprep.mubr.f32.mxu1 %v1011_v3 }
  0x3c   :  { %787 = vmatmul.mubr.msk.f32.gmra.mrb[24].mxu0 %vm134_vm0, %v26_v54 }
  0x3d   :  { %827 = vmatmul.mubr.msk.f32.gmra.mrb[24].mxu1 %vm134_vm0, %v26_v54  ;;  %325 = vmatprep.mubr.f32.mxu0 %v1011_v3 }
  0x3e   :  { %623 = vmatprep.mubr.f32.mxu1 %v1011_v3 }
  0x40   :  { %788 = vmatmul.mubr.msk.f32.gmra.mrb[26].mxu0 %vm134_vm0, %v27_v55 }
  0x41   :  { %828 = vmatmul.mubr.msk.f32.gmra.mrb[26].mxu1 %vm134_vm0, %v27_v55  ;;  %331 = vmatprep.mubr.f32.mxu0 %v1011_v3 }
  0x42   :  { %629 = vmatprep.mubr.f32.mxu1 %v1011_v3 }
  0x44   :  { %789 = vmatmul.mubr.msk.f32.gmra.mrb[28].mxu0 %vm134_vm0, %v28_v56 }
  0x45   :  { %829 = vmatmul.mubr.msk.f32.gmra.mrb[28].mxu1 %vm134_vm0, %v28_v56  ;;  %337 = vmatprep.mubr.f32.mxu0 %v1011_v3 }
  0x46   :  { %635 = vmatprep.mubr.f32.mxu1 %v1011_v3 }
  0x48   :  { %790 = vmatmul.mubr.msk.f32.gmra.mrb[30].mxu0 %vm134_vm0, %v29_v57 }
  0x49   :  { %830 = vmatmul.mubr.msk.f32.gmra.mrb[30].mxu1 %vm134_vm0, %v29_v57 }
  0x87   :  { %v97_v18 = vpop.permute.xlu0 %96 }
  0x88   :  { %v107_v22 = vpop.permute.xlu1 %106 }
  0x8b   :  { %v102_v27 = vpop.permute.xlu0 %101 }
  0x8d   :  { %v1305_v29 = vpop.permute.xlu1 %111 }
  0x8f   :  { %v1307_v39 = vpop.permute.xlu0 %116 }
  0x91   :  { %v1309_v47 = vpop.permute.xlu1 %121 }
  0xdf   :  { %v1241_v58 = vpop.f32.mrb[0].mxu0 }
  0xe0   :  { %v1243_v59 = vpop.f32.mrb[0].mxu1  ;;  %v1245_v60 = vpop.f32.mrb[1].mxu0 }
  0xe1   :  { %v1247_v61 = vpop.f32.mrb[1].mxu1 }
  0xe3   :  { %v1249_v62 = vpop.f32.mrb[2].mxu0 }
  0xe4   :  { %v1251_v63 = vpop.f32.mrb[2].mxu1  ;;  %v1253_v0 = vpop.f32.mrb[3].mxu0 }
  0xe5   :  { %v1255_v1 = vpop.f32.mrb[3].mxu1 }
  0xe7   :  { %v1257_v2 = vpop.f32.mrb[4].mxu0 }
  0xe8   :  { %v1259_v3 = vpop.f32.mrb[4].mxu1  ;;  %v1261_v4 = vpop.f32.mrb[5].mxu0 }
  0xe9   :  { %v1263_v5 = vpop.f32.mrb[5].mxu1 }
  0xeb   :  { %v1265_v6 = vpop.f32.mrb[6].mxu0 }
  0xec   :  { %v1267_v7 = vpop.f32.mrb[6].mxu1  ;;  %v1269_v8 = vpop.f32.mrb[7].mxu0 }
  0xed   :  { %v1271_v9 = vpop.f32.mrb[7].mxu1 }
  0xef   :  { %v1273_v10 = vpop.f32.mrb[8].mxu0 }
  0xf0   :  { %v1275_v11 = vpop.f32.mrb[8].mxu1  ;;  %v1277_v12 = vpop.f32.mrb[9].mxu0 }
  0xf1   :  { %v1279_v13 = vpop.f32.mrb[9].mxu1 }
  0xf3   :  { %v1281_v14 = vpop.f32.mrb[10].mxu0 }
  0xf4   :  { %v1283_v15 = vpop.f32.mrb[10].mxu1  ;;  %v1285_v16 = vpop.f32.mrb[11].mxu0 }
  0xf5   :  { %v1287_v17 = vpop.f32.mrb[11].mxu1 }
  0xf7   :  { %v1289_v19 = vpop.f32.mrb[12].mxu0 }
  0xf8   :  { %v1291_v20 = vpop.f32.mrb[12].mxu1  ;;  %v1293_v21 = vpop.f32.mrb[13].mxu0 }
  0xf9   :  { %v1295_v23 = vpop.f32.mrb[13].mxu1 }
  0xfb   :  { %v1297_v24 = vpop.f32.mrb[14].mxu0 }
  0xfc   :  { %1530 = vst [vmem:[#allocation2_spill] sm:$0xff] %v1297_v24  ;;  %v1299_v25 = vpop.f32.mrb[14].mxu1  ;;  %v1301_v26 = vpop.f32.mrb[15].mxu0 }
  0xfd   :  { %1531 = vst [vmem:[#allocation3_spill] sm:$0xff] %v1299_v25  ;;  %1532 = vst [vmem:[#allocation4_spill] sm:$0xff] %v1301_v26  ;;  %v1303_v28 = vpop.f32.mrb[15].mxu1 }
  0xfe   :  { %1533 = vst [vmem:[#allocation5_spill] sm:$0xff] %v1303_v28 }
  0xff   :  { %v297_v30 = vpop.f32.mrb[16].mxu0 }
 0x100   :  { %v298_v31 = vadd.f32 %v297_v30, %v97_v18  ;;  %v595_v32 = vpop.f32.mrb[16].mxu1  ;;  %v299_v33 = vpop.f32.mrb[17].mxu0 }
 0x101   :  { %v596_v34 = vadd.f32 %v595_v32, %v97_v18  ;;  %v300_v35 = vadd.f32 %v299_v33, %v97_v18  ;;  %v597_v36 = vpop.f32.mrb[17].mxu1 }
 0x102   :  { %v791_v37 = vmul.f32 -1.442695, %v298_v31  ;;  %v598_v38 = vadd.f32 %v597_v36, %v97_v18  ;;  %v1311_v31 = vpop.permute.xlu0 %126 }
 0x103   :  { %v831_v40 = vmul.f32 -1.442695, %v596_v34  ;;  %v792_v41 = vmul.f32 -1.442695, %v300_v35  ;;  %v303_v42 = vpop.f32.mrb[18].mxu0 }
 0x104   :  { %883 = vpow2.f32 %v791_v37  ;;  %v832_v43 = vmul.f32 -1.442695, %v598_v38  ;;  %v304_v44 = vadd.f32 %v303_v42, %v102_v27  ;;  %v601_v45 = vpop.f32.mrb[18].mxu1  ;;  %v305_v46 = vpop.f32.mrb[19].mxu0 }
 0x105   :  { %885 = vpow2.f32 %v831_v40  ;;  %v602_v48 = vadd.f32 %v601_v45, %v102_v27  ;;  %v306_v49 = vadd.f32 %v305_v46, %v102_v27  ;;  %v603_v50 = vpop.f32.mrb[19].mxu1  ;;  %v1313_v37 = vpop.permute.xlu1 %131 }
 0x106   :  { %887 = vpow2.f32 %v792_v41  ;;  %v793_v51 = vmul.f32 -1.442695, %v304_v44  ;;  %v604_v52 = vadd.f32 %v603_v50, %v102_v27  ;;  %v57_v50 = vpop.permute.xlu0 %56 }
 0x107   :  { %889 = vpow2.f32 %v832_v43  ;;  %v833_v53 = vmul.f32 -1.442695, %v602_v48  ;;  %v794_v54 = vmul.f32 -1.442695, %v306_v49  ;;  %v309_v55 = vpop.f32.mrb[20].mxu0 }
 0x108   :  { %891 = vpow2.f32 %v793_v51  ;;  %v834_v56 = vmul.f32 -1.442695, %v604_v52  ;;  %v310_v57 = vadd.f32 %v309_v55, %v107_v22  ;;  %v607_v18 = vpop.f32.mrb[20].mxu1  ;;  %v311_v30 = vpop.f32.mrb[21].mxu0 }
 0x109   :  { %893 = vpow2.f32 %v833_v53  ;;  %v608_v32 = vadd.f32 %v607_v18, %v107_v22  ;;  %v312_v33 = vadd.f32 %v311_v30, %v107_v22  ;;  %v609_v34 = vpop.f32.mrb[21].mxu1 }
 0x10a   :  { %895 = vpow2.f32 %v794_v54  ;;  %v795_v35 = vmul.f32 -1.442695, %v310_v57  ;;  %v610_v36 = vadd.f32 %v609_v34, %v107_v22 }
 0x10b   :  { %897 = vpow2.f32 %v834_v56  ;;  %v835_v27 = vmul.f32 -1.442695, %v608_v32  ;;  %v796_v38 = vmul.f32 -1.442695, %v312_v33  ;;  %v315_v40 = vpop.f32.mrb[22].mxu0  ;;  %v62_v32 = vpop.permute.xlu1 %61 }
 0x10c   :  { %899 = vpow2.f32 %v795_v35  ;;  %v836_v41 = vmul.f32 -1.442695, %v610_v36  ;;  %v316_v42 = vadd.f32 %v315_v40, %v1305_v29  ;;  %v613_v43 = vpop.f32.mrb[22].mxu1  ;;  %v317_v44 = vpop.f32.mrb[23].mxu0  ;;  %v250_v35 = vadd.f32 %v1241_v58, %v57_v50 }
 0x10d   :  { %901 = vpow2.f32 %v835_v27  ;;  %v615_v45 = vpop.f32.mrb[23].mxu1  ;;  %v548_v40 = vadd.f32 %v1243_v59, %v57_v50  ;;  %v1331_v58 = vadd.f32 %v1249_v62, %v62_v32 }
 0x10e   :  { %v884_v46 = vpop.eup %883  ;;  %903 = vpow2.f32 %v796_v38  ;;  %v797_v48 = vmul.f32 -1.442695, %v316_v42 }
 0x10f   :  { %v886_v49 = vpop.eup %885  ;;  %v392_v22 = vadd.f32 1.0, %v884_v46  ;;  %905 = vpow2.f32 %v836_v41  ;;  %v321_v51 = vpop.f32.mrb[24].mxu0  ;;  %v1321_v41 = vadd.f32 %v1245_v60, %v57_v50  ;;  %v1336_v60 = vadd.f32 %v1251_v63, %v62_v32 }
 0x110   :  { %v888_v52 = vpop.eup %887  ;;  %v690_v53 = vadd.f32 1.0, %v886_v49  ;;  %907 = vpow2.f32 %v797_v48  ;;  %v619_v54 = vpop.f32.mrb[24].mxu1 }
 0x111   :  { %v323_v55 = vpop.f32.mrb[25].mxu0  ;;  %v890_v56 = vpop.eup %889  ;;  %909 = vrcp.f32 %v392_v22  ;;  %v393_v57 = vadd.f32 1.0, %v888_v52  ;;  %v1328_v22 = vadd.f32 %v1247_v61, %v57_v50  ;;  %v1342_v61 = vadd.f32 %v1253_v0, %v62_v32 }
 0x112   :  { %v1316_v18 = vpop.f32.mrb[25].mxu1  ;;  %v892_v30 = vpop.eup %891  ;;  %911 = vrcp.f32 %v690_v53  ;;  %v691_v33 = vadd.f32 1.0, %v890_v56  ;;  %v318_v50 = vadd.f32 %v317_v44, %v1305_v29  ;;  %v322_v44 = vadd.f32 %v321_v51, %v1307_v39 }
 0x113   :  { %v894_v34 = vpop.eup %893  ;;  %913 = vrcp.f32 %v393_v57  ;;  %v394_v36 = vadd.f32 1.0, %v892_v30  ;;  %v327_v27 = vpop.f32.mrb[26].mxu0  ;;  %v614_v30 = vadd.f32 %v613_v43, %v1305_v29  ;;  %v324_v25 = vadd.f32 %v323_v55, %v1307_v39 }
 0x114   :  { %v896_v38 = vpop.eup %895  ;;  %915 = vrcp.f32 %v691_v33  ;;  %v692_v42 = vadd.f32 1.0, %v894_v34  ;;  %v1323_v46 = vpop.f32.mrb[26].mxu1  ;;  %v798_v26 = vmul.f32 -1.442695, %v318_v50  ;;  %v622_v24 = vadd.f32 %v1316_v18, %v1307_v39 }
 0x115   :  { %v1325_v48 = vpop.f32.mrb[27].mxu0  ;;  %v898_v49 = vpop.eup %897  ;;  %917 = vrcp.f32 %v394_v36  ;;  %v395_v52 = vadd.f32 1.0, %v896_v38  ;;  %v1346_v38 = vadd.f32 %v1255_v1, %v62_v32  ;;  %v328_v50 = vadd.f32 %v327_v27, %v1309_v47 }
 0x116   :  { %v1333_v53 = vpop.f32.mrb[27].mxu1  ;;  %v900_v59 = vpop.eup %899  ;;  %919 = vrcp.f32 %v692_v42  ;;  %v693_v57 = vadd.f32 1.0, %v898_v49  ;;  %v616_v42 = vadd.f32 %v615_v45, %v1305_v29  ;;  %v620_v29 = vadd.f32 %v619_v54, %v1307_v39 }
 0x117   :  { %v1338_v56 = vpop.permute.xlu0 %66  ;;  %v902_v33 = vpop.eup %901  ;;  %921 = vrcp.f32 %v395_v52  ;;  %v396_v62 = vadd.f32 1.0, %v900_v59  ;;  %v626_v18 = vadd.f32 %v1323_v46, %v1309_v47  ;;  %v840_v46 = vmul.f32 -1.442695, %v622_v24 }
 0x118   :  { %v333_v34 = vpop.f32.mrb[28].mxu0  ;;  %v904_v36 = vpop.eup %903  ;;  %923 = vrcp.f32 %v693_v57  ;;  %v694_v63 = vadd.f32 1.0, %v902_v33  ;;  %v1353_v0 = vadd.f32 %v1257_v2, %v1338_v56  ;;  %v837_v57 = vmul.f32 -1.442695, %v614_v30 }
 0x119   :  { %v631_v49 = vpop.f32.mrb[28].mxu1  ;;  %v1349_v28 = vpop.f32.mrb[29].mxu0  ;;  %925 = vrcp.f32 %v396_v62  ;;  %v397_v52 = vadd.f32 1.0, %v904_v36  ;;  %v838_v51 = vmul.f32 -1.442695, %v616_v42 }
 0x11a   :  { %v906_v43 = vpop.eup %905  ;;  %v1356_v59 = vpop.f32.mrb[29].mxu1  ;;  %927 = vrcp.f32 %v694_v63  ;;  %v839_v39 = vmul.f32 -1.442695, %v620_v29 }
 0x11b   :  { %v908_v1 = vpop.eup %907  ;;  %v695_v32 = vadd.f32 1.0, %v906_v43  ;;  %929 = vrcp.f32 %v397_v52  ;;  %v1360_v2 = vpop.f32.mrb[30].mxu0  ;;  %v799_v52 = vmul.f32 -1.442695, %v322_v44  ;;  %v330_v44 = vadd.f32 %v1325_v48, %v1309_v47 }
 0x11c   :  { %v910_v45 = vpop.eup %909  ;;  %v398_v33 = vadd.f32 1.0, %v908_v1  ;;  %v1364_v63 = vpop.f32.mrb[30].mxu1  ;;  %v334_v48 = vadd.f32 %v333_v34, %v1311_v31 }
 0x11d   :  { %v912_v62 = vpop.eup %911  ;;  %v440_v36 = vmul.f32 %v910_v45, %v250_v35  ;;  %931 = vrcp.f32 %v695_v32  ;;  %v1366_v30 = vpop.f32.mrb[31].mxu0  ;;  %v560_v45 = vadd.f32 %v1259_v3, %v1338_v56 }
 0x11e   :  { %v914_v54 = vpop.eup %913  ;;  %v738_v43 = vmul.f32 %v912_v62, %v548_v40  ;;  %933 = vrcp.f32 %v398_v33  ;;  %v1369_v55 = vpop.f32.mrb[31].mxu1  ;;  %v800_v40 = vmul.f32 -1.442695, %v324_v25  ;;  %v802_v33 = vmul.f32 -1.442695, %v330_v44 }
 0x11f   :  { %v916_v1 = vpop.eup %915  ;;  %456 = vst [vmem:[%s1529_s3] sm:$0xff] %v440_v36  ;;  %v441_v35 = vmul.f32 %v914_v54, %v1321_v41  ;;  %935 = vpow2.f32 %v837_v57  ;;  %v628_v57 = vadd.f32 %v1333_v53, %v1309_v47  ;;  %v841_v47 = vmul.f32 -1.442695, %v626_v18 }
 0x120   :  { %v918_v42 = vpop.eup %917  ;;  %847 = vst [vmem:[%s1529_s3 + $0x80] sm:$0xff] %v738_v43  ;;  %v739_v27 = vmul.f32 %v916_v1, %v1328_v22  ;;  %937 = vpow2.f32 %v798_v26  ;;  %v801_v26 = vmul.f32 -1.442695, %v328_v50  ;;  %v803_v54 = vmul.f32 -1.442695, %v334_v48 }
 0x121   :  { %v920_v32 = vpop.eup %919  ;;  %457 = vst [vmem:[%s1529_s3 + $0x8] sm:$0xff] %v441_v35  ;;  %v442_v41 = vmul.f32 %v918_v42, %v1331_v58  ;;  %939 = vpow2.f32 %v838_v51  ;;  %v632_v58 = vadd.f32 %v631_v49, %v1311_v31  ;;  %v842_v49 = vmul.f32 -1.442695, %v628_v57 }
 0x122   :  { %v922_v29 = vpop.eup %921  ;;  %848 = vst [vmem:[%s1529_s3 + $0x88] sm:$0xff] %v739_v27  ;;  %v740_v25 = vmul.f32 %v920_v32, %v1336_v60  ;;  %941 = vpow2.f32 %v799_v52  ;;  %v1401_v60 = vpop.permute.xlu1 %71  ;;  %v562_v51 = vadd.f32 %v1263_v5, %v1338_v56 }
 0x123   :  { %v924_v22 = vpop.eup %923  ;;  %458 = vst [vmem:[%s1529_s3 + $0x10] sm:$0xff] %v442_v41  ;;  %v443_v24 = vmul.f32 %v922_v29, %v1342_v61  ;;  %943 = vpow2.f32 %v839_v39  ;;  %v264_v61 = vadd.f32 %v1261_v4, %v1338_v56  ;;  %v268_v43 = vadd.f32 %v1265_v6, %v1401_v60 }
 0x124   :  { %v926_v53 = vpop.eup %925  ;;  %849 = vst [vmem:[%s1529_s3 + $0x90] sm:$0xff] %v740_v25  ;;  %v741_v34 = vmul.f32 %v924_v22, %v1346_v38  ;;  %945 = vpow2.f32 %v800_v40  ;;  %v843_v52 = vmul.f32 -1.442695, %v632_v58  ;;  %v336_v22 = vadd.f32 %v1349_v28, %v1311_v31 }
 0x125   :  { %v928_v62 = vpop.eup %927  ;;  %459 = vst [vmem:[%s1529_s3 + $0x18] sm:$0xff] %v443_v24  ;;  %v444_v3 = vmul.f32 %v926_v53, %v1353_v0  ;;  %947 = vpow2.f32 %v840_v46  ;;  %v634_v58 = vadd.f32 %v1356_v59, %v1311_v31  ;;  %v77_v31 = vpop.permute.xlu0 %76 }
 0x126   :  { %v930_v36 = vpop.eup %929  ;;  %850 = vst [vmem:[%s1529_s3 + $0x98] sm:$0xff] %v741_v34  ;;  %v742_v38 = vmul.f32 %v928_v62, %v560_v45  ;;  %949 = vpow2.f32 %v801_v26  ;;  %v566_v45 = vadd.f32 %v1267_v7, %v1401_v60  ;;  %v342_v7 = vadd.f32 %v1366_v30, %v1313_v37 }
 0x127   :  { %v932_v4 = vpop.eup %931  ;;  %460 = vst [vmem:[%s1529_s3 + $0x20] sm:$0xff] %v444_v3  ;;  %v445_v0 = vmul.f32 %v930_v36, %v264_v61  ;;  %951 = vpow2.f32 %v841_v47  ;;  %v270_v61 = vadd.f32 %v1269_v8, %v1401_v60  ;;  %v638_v3 = vadd.f32 %v1364_v63, %v1313_v37 }
 0x128   :  { %v934_v50 = vpop.eup %933  ;;  %851 = vst [vmem:[%s1529_s3 + $0xa0] sm:$0xff] %v742_v38  ;;  %v743_v5 = vmul.f32 %v932_v4, %v562_v51  ;;  %953 = vpow2.f32 %v802_v33  ;;  %v340_v33 = vadd.f32 %v1360_v2, %v1313_v37  ;;  %v804_v36 = vmul.f32 -1.442695, %v336_v22 }
 0x129   :  { %v936_v56 = vpop.eup %935  ;;  %461 = vst [vmem:[%s1529_s3 + $0x28] sm:$0xff] %v445_v0  ;;  %v446_v6 = vmul.f32 %v934_v50, %v268_v43  ;;  %955 = vpow2.f32 %v842_v49  ;;  %v844_v38 = vmul.f32 -1.442695, %v634_v58  ;;  %v640_v8 = vadd.f32 %v1369_v55, %v1313_v37 }
 0x12a   :  { %v938_v1 = vpop.eup %937  ;;  %852 = vst [vmem:[%s1529_s3 + $0xa8] sm:$0xff] %v743_v5  ;;  %v696_v35 = vadd.f32 1.0, %v936_v56  ;;  %957 = vpow2.f32 %v803_v54  ;;  %v568_v4 = vadd.f32 %v1271_v9, %v1401_v60  ;;  %v805_v43 = vmul.f32 -1.442695, %v340_v33 }
 0x12b   :  { %v940_v39 = vpop.eup %939  ;;  %462 = vst [vmem:[%s1529_s3 + $0x30] sm:$0xff] %v446_v6  ;;  %v399_v18 = vadd.f32 1.0, %v938_v1  ;;  %959 = vpow2.f32 %v843_v52  ;;  %v274_v52 = vadd.f32 %v1273_v10, %v77_v31  ;;  %v845_v30 = vmul.f32 -1.442695, %v638_v3  ;;  %v82_v6 = vpop.permute.xlu1 %81 }
 0x12c   :  { %v942_v42 = vpop.eup %941  ;;  %961 = vrcp.f32 %v696_v35  ;;  %v697_v27 = vadd.f32 1.0, %v940_v39  ;;  %v572_v56 = vadd.f32 %v1275_v11, %v77_v31  ;;  %v806_v9 = vmul.f32 -1.442695, %v342_v7 }
 0x12d   :  { %v944_v40 = vpop.eup %943  ;;  %963 = vrcp.f32 %v399_v18  ;;  %v400_v44 = vadd.f32 1.0, %v942_v42  ;;  %v276_v60 = vadd.f32 %v1277_v12, %v77_v31  ;;  %v846_v1 = vmul.f32 -1.442695, %v640_v8 }
 0x12e   :  { %v946_v32 = vpop.eup %945  ;;  %965 = vrcp.f32 %v697_v27  ;;  %v698_v41 = vadd.f32 1.0, %v944_v40  ;;  %v574_v11 = vadd.f32 %v1279_v13, %v77_v31  ;;  %v280_v42 = vadd.f32 %v1281_v14, %v82_v6 }
 0x12f   :  { %v948_v46 = vpop.eup %947  ;;  %967 = vrcp.f32 %v400_v44  ;;  %v401_v57 = vadd.f32 1.0, %v946_v32  ;;  %v578_v40 = vadd.f32 %v1283_v15, %v82_v6  ;;  %v87_v44 = vpop.permute.xlu0 %86 }
 0x130   :  { %v950_v29 = vpop.eup %949  ;;  %969 = vrcp.f32 %v698_v41  ;;  %v699_v25 = vadd.f32 1.0, %v948_v46  ;;  %v282_v41 = vadd.f32 %v1285_v16, %v82_v6  ;;  %v92_v31 = vpop.permute.xlu1 %91  ;;  %v586_v7 = vadd.f32 %v1295_v23, %v87_v44 }
 0x131   :  { %v952_v26 = vpop.eup %951  ;;  %971 = vrcp.f32 %v401_v57  ;;  %v402_v48 = vadd.f32 1.0, %v950_v29  ;;  %v580_v57 = vadd.f32 %v1287_v17, %v82_v6 }
 0x132   :  { %v954_v24 = vpop.eup %953  ;;  %973 = vrcp.f32 %v699_v25  ;;  %v700_v47 = vadd.f32 1.0, %v952_v26  ;;  %v286_v25 = vadd.f32 %v1289_v19, %v87_v44 }
 0x133   :  { %v956_v53 = vpop.eup %955  ;;  %975 = vrcp.f32 %v402_v48  ;;  %v403_v34 = vadd.f32 1.0, %v954_v24  ;;  %v584_v48 = vadd.f32 %v1291_v20, %v87_v44 }
 0x134   :  { %v958_v62 = vpop.eup %957  ;;  %977 = vrcp.f32 %v700_v47  ;;  %v701_v28 = vadd.f32 1.0, %v956_v53 }
 0x135   :  { %v960_v49 = vpop.eup %959  ;;  %979 = vrcp.f32 %v403_v34  ;;  %v404_v59 = vadd.f32 1.0, %v958_v62 }
 0x136   :  { %v962_v51 = vpop.eup %961  ;;  %981 = vrcp.f32 %v701_v28  ;;  %v702_v2 = vadd.f32 1.0, %v960_v49 }
 0x137   :  { %v964_v54 = vpop.eup %963  ;;  %v744_v63 = vmul.f32 %v962_v51, %v566_v45  ;;  %983 = vrcp.f32 %v404_v59  ;;  %v288_v59 = vadd.f32 %v1293_v21, %v87_v44 }
 0x138   :  { %v966_v0 = vpop.eup %965  ;;  %v447_v50 = vmul.f32 %v964_v54, %v270_v61  ;;  %985 = vrcp.f32 %v702_v2  ;;  %v1534_v2 = vld [vmem:[#allocation2_spill] sm:$0xff] }
 0x139   :  { %v968_v5 = vpop.eup %967  ;;  %853 = vst [vmem:[%s1529_s3 + $0xb0] sm:$0xff] %v744_v63  ;;  %v745_v37 = vmul.f32 %v966_v0, %v568_v4  ;;  %987 = vpow2.f32 %v804_v36  ;;  %v1535_v4 = vld [vmem:[#allocation3_spill] sm:$0xff] }
 0x13a   :  { %v970_v55 = vpop.eup %969  ;;  %463 = vst [vmem:[%s1529_s3 + $0x38] sm:$0xff] %v447_v50  ;;  %v448_v10 = vmul.f32 %v968_v5, %v274_v52  ;;  %989 = vpow2.f32 %v844_v38  ;;  %v292_v38 = vadd.f32 %v1534_v2, %v92_v31  ;;  %v590_v63 = vadd.f32 %v1535_v4, %v92_v31  ;;  %v1536_v52 = vld [vmem:[#allocation4_spill] sm:$0xff]  ;;  %v1537_v5 = vld [vmem:[#allocation5_spill] sm:$0xff] }
 0x13b   :  { %v972_v35 = vpop.eup %971  ;;  %854 = vst [vmem:[%s1529_s3 + $0xb8] sm:$0xff] %v745_v37  ;;  %v746_v39 = vmul.f32 %v970_v55, %v572_v56  ;;  %991 = vpow2.f32 %v805_v43  ;;  %v294_v50 = vadd.f32 %v1536_v52, %v92_v31  ;;  %v592_v56 = vadd.f32 %v1537_v5, %v92_v31 }
 0x13c   :  { %v974_v18 = vpop.eup %973  ;;  %464 = vst [vmem:[%s1529_s3 + $0x40] sm:$0xff] %v448_v10  ;;  %v449_v12 = vmul.f32 %v972_v35, %v276_v60  ;;  %993 = vpow2.f32 %v845_v30 }
 0x13d   :  { %v976_v27 = vpop.eup %975  ;;  %855 = vst [vmem:[%s1529_s3 + $0xc0] sm:$0xff] %v746_v39  ;;  %v747_v13 = vmul.f32 %v974_v18, %v574_v11  ;;  %995 = vpow2.f32 %v806_v9 }
 0x13e   :  { %v978_v32 = vpop.eup %977  ;;  %465 = vst [vmem:[%s1529_s3 + $0x48] sm:$0xff] %v449_v12  ;;  %v450_v14 = vmul.f32 %v976_v27, %v280_v42  ;;  %997 = vpow2.f32 %v846_v1 }
 0x13f   :  { %v980_v46 = vpop.eup %979  ;;  %856 = vst [vmem:[%s1529_s3 + $0xc8] sm:$0xff] %v747_v13  ;;  %v748_v15 = vmul.f32 %v978_v32, %v578_v40 }
 0x140   :  { %v982_v29 = vpop.eup %981  ;;  %466 = vst [vmem:[%s1529_s3 + $0x50] sm:$0xff] %v450_v14  ;;  %v451_v16 = vmul.f32 %v980_v46, %v282_v41 }
 0x141   :  { %v984_v26 = vpop.eup %983  ;;  %857 = vst [vmem:[%s1529_s3 + $0xd0] sm:$0xff] %v748_v15  ;;  %v749_v17 = vmul.f32 %v982_v29, %v580_v57 }
 0x142   :  { %v986_v22 = vpop.eup %985  ;;  %467 = vst [vmem:[%s1529_s3 + $0x58] sm:$0xff] %v451_v16  ;;  %v452_v24 = vmul.f32 %v984_v26, %v286_v25 }
 0x143   :  { %v988_v19 = vpop.eup %987  ;;  %858 = vst [vmem:[%s1529_s3 + $0xd8] sm:$0xff] %v749_v17  ;;  %v750_v47 = vmul.f32 %v986_v22, %v584_v48 }
 0x144   :  { %v990_v58 = vpop.eup %989  ;;  %468 = vst [vmem:[%s1529_s3 + $0x60] sm:$0xff] %v452_v24  ;;  %v405_v20 = vadd.f32 1.0, %v988_v19 }
 0x145   :  { %v992_v53 = vpop.eup %991  ;;  %859 = vst [vmem:[%s1529_s3 + $0xe0] sm:$0xff] %v750_v47  ;;  %v703_v45 = vadd.f32 1.0, %v990_v58 }
 0x146   :  { %v994_v34 = vpop.eup %993  ;;  %999 = vrcp.f32 %v405_v20  ;;  %v406_v33 = vadd.f32 1.0, %v992_v53 }
 0x147   :  { %v996_v62 = vpop.eup %995  ;;  %1001 = vrcp.f32 %v703_v45  ;;  %v704_v61 = vadd.f32 1.0, %v994_v34 }
 0x148   :  { %v998_v28 = vpop.eup %997  ;;  %1003 = vrcp.f32 %v406_v33  ;;  %v407_v3 = vadd.f32 1.0, %v996_v62 }
 0x149   :  { %1005 = vrcp.f32 %v704_v61  ;;  %v705_v49 = vadd.f32 1.0, %v998_v28 }
 0x14a   :  { %1007 = vrcp.f32 %v407_v3 }
 0x14b   :  { %1009 = vrcp.f32 %v705_v49 }
 0x150   :  { %v1000_v36 = vpop.eup %999 }
 0x151   :  { %v1002_v51 = vpop.eup %1001  ;;  %v453_v8 = vmul.f32 %v1000_v36, %v288_v59 }
 0x152   :  { %v1004_v54 = vpop.eup %1003  ;;  %v751_v43 = vmul.f32 %v1002_v51, %v586_v7 }
 0x153   :  { %v1006_v0 = vpop.eup %1005  ;;  %469 = vst [vmem:[%s1529_s3 + $0x68] sm:$0xff] %v453_v8  ;;  %v454_v30 = vmul.f32 %v1004_v54, %v292_v38 }
 0x154   :  { %v1008_v21 = vpop.eup %1007  ;;  %860 = vst [vmem:[%s1529_s3 + $0xe8] sm:$0xff] %v751_v43  ;;  %v752_v23 = vmul.f32 %v1006_v0, %v590_v63 }
 0x155   :  { %v1010_v6 = vpop.eup %1009  ;;  %470 = vst [vmem:[%s1529_s3 + $0x70] sm:$0xff] %v454_v30  ;;  %v455_v37 = vmul.f32 %v1008_v21, %v294_v50 }
 0x156   :  { %861 = vst [vmem:[%s1529_s3 + $0xf0] sm:$0xff] %v752_v23  ;;  %v753_v9 = vmul.f32 %v1010_v6, %v592_v56 }
 0x157   :  { %471 = vst [vmem:[%s1529_s3 + $0x78] sm:$0xff] %v455_v37 }
 0x158   :  { %862 = vst [vmem:[%s1529_s3 + $0xf8] sm:$0xff] %v753_v9 }

</bundles_post_ra>
